<compile_context>
chip_gen: v6e
topology: v6e:2x2x1
jax: 0.10.0
libtpu: 0.0.40
codegen_flags: <defaults>
</compile_context>

<pallas_src>
import jax
import jax.numpy as jnp
from jax.experimental import pallas as pl
from jax.experimental.pallas import tpu as pltpu

_LANE = 128


def _affine_kernel(a_ref, x_ref, b_ref, o_ref):
    # a_ref: (1, 9, S, 128); x_ref / b_ref / o_ref: (1, 3, S, 128)
    f32 = jnp.float32
    x0 = x_ref[0, 0].astype(f32)
    x1 = x_ref[0, 1].astype(f32)
    x2 = x_ref[0, 2].astype(f32)
    for i in range(3):
        acc = b_ref[0, i].astype(f32)
        acc = acc + a_ref[0, 3 * i + 0].astype(f32) * x0
        acc = acc + a_ref[0, 3 * i + 1].astype(f32) * x1
        acc = acc + a_ref[0, 3 * i + 2].astype(f32) * x2
        o_ref[0, i] = acc.astype(o_ref.dtype)  # direct dense store per channel


def init_affine_params(batch_size, num_points, dtype=jnp.float32):
    """Module __init__ equivalent, stored natively in plane layout.

    Returns:
      A_planes: (B, 9, N), identity per point (channels 0, 4, 8 are 1).
      b_planes: (B, 3, N), zeros.
    """
    eye_rows = jnp.eye(3, dtype=dtype).reshape(9)                      # (9,)
    A_planes = jnp.broadcast_to(eye_rows[None, :, None],
                                (batch_size, 9, num_points)).astype(dtype)
    b_planes = jnp.zeros((batch_size, 3, num_points), dtype)
    return A_planes, b_planes


def params_from_matrix_layout(A, b):
    """One-time conversion from the PyTorch storage layout.

    A: (B, N, 3, 3), b: (B, N, 3, 1) -> (B, 9, N), (B, 3, N).
    Do this once at parameter creation, not per forward call.
    """
    B, N = A.shape[:2]
    A_planes = jnp.transpose(A, (0, 2, 3, 1)).reshape(B, 9, N)
    b_planes = jnp.transpose(b[..., 0], (0, 2, 1))
    return A_planes, b_planes


def affine_transform_local(A_planes, b_planes, x, *, tile_points=8192):
    """Forward pass: out[b, n, i] = sum_j A[b, n, i, j] * x[b, n, j] + b[b, n, i].

    A_planes: (B, 9, N) plane-layout A (channel i*3+j).
    b_planes: (B, 3, N) plane-layout b.
    x:        (B, N, 3).
    Returns:  (B, N, 3).
    """
    B, N, _ = x.shape
    assert A_planes.shape == (B, 9, N)
    assert b_planes.shape == (B, 3, N)

    # --- tile sizing: S sublanes of 128 lanes per grid step ---------------
    n128 = -(-N // _LANE)                       # number of 128-point lane groups
    s_target = max(1, tile_points // _LANE)
    if s_target >= n128:
        s = n128                                # whole point axis in one tile
    else:
        s = max(8, (s_target // 8) * 8)         # keep (8,128) tiling constraint
    n128_pad = -(-n128 // s) * s
    n_pad = n128_pad * _LANE

    # --- glue: x to channel-major plane; pad ragged tail with zeros -------
    x_p = jnp.transpose(x, (0, 2, 1))           # (B, 3, N)
    if n_pad != N:
        pad = ((0, 0), (0, 0), (0, n_pad - N))
        x_p = jnp.pad(x_p, pad)
        A_p = jnp.pad(A_planes, pad)
        b_p = jnp.pad(b_planes, pad)
    else:
        A_p, b_p = A_planes, b_planes

    A4 = A_p.reshape(B, 9, n128_pad, _LANE)
    x4 = x_p.reshape(B, 3, n128_pad, _LANE)
    b4 = b_p.reshape(B, 3, n128_pad, _LANE)

    grid = (B, n128_pad // s)

    out4 = pl.pallas_call(
        _affine_kernel,
        out_shape=jax.ShapeDtypeStruct((B, 3, n128_pad, _LANE), x.dtype),
        grid_spec=pltpu.PrefetchScalarGridSpec(
            num_scalar_prefetch=0,
            grid=grid,
            in_specs=[
                pl.BlockSpec((1, 9, s, _LANE), lambda bi, ni: (bi, 0, ni, 0)),
                pl.BlockSpec((1, 3, s, _LANE), lambda bi, ni: (bi, 0, ni, 0)),
                pl.BlockSpec((1, 3, s, _LANE), lambda bi, ni: (bi, 0, ni, 0)),
            ],
            out_specs=pl.BlockSpec((1, 3, s, _LANE), lambda bi, ni: (bi, 0, ni, 0)),
        ),
        compiler_params=pltpu.CompilerParams(
            dimension_semantics=("parallel", "parallel")),
    )(A4, x4, b4)

    out_p = out4.reshape(B, 3, n_pad)[:, :, :N]     # drop tail padding
    return jnp.transpose(out_p, (0, 2, 1))          # (B, N, 3)


# TODO(synk): stiffness() (edge-indexed parameter gather + squared diff) is a sparse
# gather over edges; it is not used by forward(return_stiff=False) and is left to
# plain JAX (jnp.take along the point axis of the plane-layout parameters).


if __name__ == "__main__":
    B, N = 2, 256
    key = jax.random.PRNGKey(0)
    k1, k2, k3 = jax.random.split(key, 3)

    # Deterministic parameter init per the module's __init__ (identity A, zero b),
    # stored natively in plane layout, plus a small deterministic perturbation so
    # the check is non-trivial.
    A_planes, b_planes = init_affine_params(B, N, jnp.float32)
    A_planes = A_planes + 0.01 * jax.random.normal(k1, (B, 9, N), jnp.float32)
    b_planes = b_planes + 0.01 * jax.random.normal(k2, (B, 3, N), jnp.float32)
    x = jax.random.normal(k3, (B, N, 3), jnp.float32)

    out = affine_transform_local(A_planes, b_planes, x)
    out = jax.block_until_ready(out)

    # Pure-JAX reference of the PyTorch forward (computed from the plane layout).
    A_mats = A_planes.reshape(B, 3, 3, N)                    # [b, i, j, n]
    ref = jnp.einsum('bijn,bnj->bni', A_mats, x) + jnp.transpose(b_planes, (0, 2, 1))

    assert out.shape == (B, N, 3)
    assert jnp.allclose(out, ref, atol=1e-5, rtol=1e-5)

    print("KERNEL_OK")
</pallas_src>

<mosaic_0001>
module attributes {stable_mosaic.version = 11 : i64} {
  func.func @_affine_kernel(%arg0: i32, %arg1: i32, %arg2: memref<1x9x2x128xf32, #tpu.memory_space<vmem>>, %arg3: memref<1x3x2x128xf32, #tpu.memory_space<vmem>>, %arg4: memref<1x3x2x128xf32, #tpu.memory_space<vmem>>, %arg5: memref<1x3x2x128xf32, #tpu.memory_space<vmem>>) attributes {dimension_semantics = [#tpu.dimension_semantics<parallel>, #tpu.dimension_semantics<parallel>], iteration_bounds = array<i64: 2, 1>, scalar_prefetch = 0 : i64, scratch_operands = 0 : i64, tpu.core_type = #tpu.core_type<tc>, window_params = [{transform_indices = @transform_0, window_bounds = array<i64: 1, 9, 2, 128>}, {transform_indices = @transform_1, window_bounds = array<i64: 1, 3, 2, 128>}, {transform_indices = @transform_2, window_bounds = array<i64: 1, 3, 2, 128>}, {transform_indices = @transform_3, window_bounds = array<i64: 1, 3, 2, 128>}]} {
    %c0 = arith.constant 0 : index
    %c0_0 = arith.constant 0 : index
    %c0_1 = arith.constant 0 : index
    %c0_2 = arith.constant 0 : index
    %0 = vector.load %arg3[%c0, %c0_0, %c0_1, %c0_2] : memref<1x3x2x128xf32, #tpu.memory_space<vmem>>, vector<1x1x2x128xf32>
    %1 = vector.shape_cast %0 : vector<1x1x2x128xf32> to vector<2x128xf32>
    %c0_3 = arith.constant 0 : index
    %c1 = arith.constant 1 : index
    %c0_4 = arith.constant 0 : index
    %c0_5 = arith.constant 0 : index
    %2 = vector.load %arg3[%c0_3, %c1, %c0_4, %c0_5] : memref<1x3x2x128xf32, #tpu.memory_space<vmem>>, vector<1x1x2x128xf32>
    %3 = vector.shape_cast %2 : vector<1x1x2x128xf32> to vector<2x128xf32>
    %c0_6 = arith.constant 0 : index
    %c2 = arith.constant 2 : index
    %c0_7 = arith.constant 0 : index
    %c0_8 = arith.constant 0 : index
    %4 = vector.load %arg3[%c0_6, %c2, %c0_7, %c0_8] : memref<1x3x2x128xf32, #tpu.memory_space<vmem>>, vector<1x1x2x128xf32>
    %5 = vector.shape_cast %4 : vector<1x1x2x128xf32> to vector<2x128xf32>
    %c0_9 = arith.constant 0 : index
    %c0_10 = arith.constant 0 : index
    %c0_11 = arith.constant 0 : index
    %c0_12 = arith.constant 0 : index
    %6 = vector.load %arg4[%c0_9, %c0_10, %c0_11, %c0_12] : memref<1x3x2x128xf32, #tpu.memory_space<vmem>>, vector<1x1x2x128xf32>
    %7 = vector.shape_cast %6 : vector<1x1x2x128xf32> to vector<2x128xf32>
    %c0_13 = arith.constant 0 : index
    %c0_14 = arith.constant 0 : index
    %c0_15 = arith.constant 0 : index
    %c0_16 = arith.constant 0 : index
    %8 = vector.load %arg2[%c0_13, %c0_14, %c0_15, %c0_16] : memref<1x9x2x128xf32, #tpu.memory_space<vmem>>, vector<1x1x2x128xf32>
    %9 = vector.shape_cast %8 : vector<1x1x2x128xf32> to vector<2x128xf32>
    %10 = arith.mulf %9, %1 : vector<2x128xf32>
    %11 = arith.addf %7, %10 : vector<2x128xf32>
    %c0_17 = arith.constant 0 : index
    %c1_18 = arith.constant 1 : index
    %c0_19 = arith.constant 0 : index
    %c0_20 = arith.constant 0 : index
    %12 = vector.load %arg2[%c0_17, %c1_18, %c0_19, %c0_20] : memref<1x9x2x128xf32, #tpu.memory_space<vmem>>, vector<1x1x2x128xf32>
    %13 = vector.shape_cast %12 : vector<1x1x2x128xf32> to vector<2x128xf32>
    %14 = arith.mulf %13, %3 : vector<2x128xf32>
    %15 = arith.addf %11, %14 : vector<2x128xf32>
    %c0_21 = arith.constant 0 : index
    %c2_22 = arith.constant 2 : index
    %c0_23 = arith.constant 0 : index
    %c0_24 = arith.constant 0 : index
    %16 = vector.load %arg2[%c0_21, %c2_22, %c0_23, %c0_24] : memref<1x9x2x128xf32, #tpu.memory_space<vmem>>, vector<1x1x2x128xf32>
    %17 = vector.shape_cast %16 : vector<1x1x2x128xf32> to vector<2x128xf32>
    %18 = arith.mulf %17, %5 : vector<2x128xf32>
    %19 = arith.addf %15, %18 : vector<2x128xf32>
    %c0_25 = arith.constant 0 : index
    %c0_26 = arith.constant 0 : index
    %c0_27 = arith.constant 0 : index
    %c0_28 = arith.constant 0 : index
    %20 = vector.load %arg5[%c0_25, %c0_26, %c0_27, %c0_28] : memref<1x3x2x128xf32, #tpu.memory_space<vmem>>, vector<1x1x2x128xf32>
    %21 = vector.shape_cast %20 : vector<1x1x2x128xf32> to vector<2x128xf32>
    %22 = vector.shape_cast %19 : vector<2x128xf32> to vector<1x1x2x128xf32>
    tpu.vector_store %arg5[%c0_25, %c0_26, %c0_27, %c0_28], %22 {strides = array<i32>} : memref<1x3x2x128xf32, #tpu.memory_space<vmem>>, vector<1x1x2x128xf32>,
    %c0_29 = arith.constant 0 : index
    %c1_30 = arith.constant 1 : index
    %c0_31 = arith.constant 0 : index
    %c0_32 = arith.constant 0 : index
    %23 = vector.load %arg4[%c0_29, %c1_30, %c0_31, %c0_32] : memref<1x3x2x128xf32, #tpu.memory_space<vmem>>, vector<1x1x2x128xf32>
    %24 = vector.shape_cast %23 : vector<1x1x2x128xf32> to vector<2x128xf32>
    %c0_33 = arith.constant 0 : index
    %c3 = arith.constant 3 : index
    %c0_34 = arith.constant 0 : index
    %c0_35 = arith.constant 0 : index
    %25 = vector.load %arg2[%c0_33, %c3, %c0_34, %c0_35] : memref<1x9x2x128xf32, #tpu.memory_space<vmem>>, vector<1x1x2x128xf32>
    %26 = vector.shape_cast %25 : vector<1x1x2x128xf32> to vector<2x128xf32>
    %27 = arith.mulf %26, %1 : vector<2x128xf32>
    %28 = arith.addf %24, %27 : vector<2x128xf32>
    %c0_36 = arith.constant 0 : index
    %c4 = arith.constant 4 : index
    %c0_37 = arith.constant 0 : index
    %c0_38 = arith.constant 0 : index
    %29 = vector.load %arg2[%c0_36, %c4, %c0_37, %c0_38] : memref<1x9x2x128xf32, #tpu.memory_space<vmem>>, vector<1x1x2x128xf32>
    %30 = vector.shape_cast %29 : vector<1x1x2x128xf32> to vector<2x128xf32>
    %31 = arith.mulf %30, %3 : vector<2x128xf32>
    %32 = arith.addf %28, %31 : vector<2x128xf32>
    %c0_39 = arith.constant 0 : index
    %c5 = arith.constant 5 : index
    %c0_40 = arith.constant 0 : index
    %c0_41 = arith.constant 0 : index
    %33 = vector.load %arg2[%c0_39, %c5, %c0_40, %c0_41] : memref<1x9x2x128xf32, #tpu.memory_space<vmem>>, vector<1x1x2x128xf32>
    %34 = vector.shape_cast %33 : vector<1x1x2x128xf32> to vector<2x128xf32>
    %35 = arith.mulf %34, %5 : vector<2x128xf32>
    %36 = arith.addf %32, %35 : vector<2x128xf32>
    %c0_42 = arith.constant 0 : index
    %c1_43 = arith.constant 1 : index
    %c0_44 = arith.constant 0 : index
    %c0_45 = arith.constant 0 : index
    %37 = vector.load %arg5[%c0_42, %c1_43, %c0_44, %c0_45] : memref<1x3x2x128xf32, #tpu.memory_space<vmem>>, vector<1x1x2x128xf32>
    %38 = vector.shape_cast %37 : vector<1x1x2x128xf32> to vector<2x128xf32>
    %39 = vector.shape_cast %36 : vector<2x128xf32> to vector<1x1x2x128xf32>
    tpu.vector_store %arg5[%c0_42, %c1_43, %c0_44, %c0_45], %39 {strides = array<i32>} : memref<1x3x2x128xf32, #tpu.memory_space<vmem>>, vector<1x1x2x128xf32>,
    %c0_46 = arith.constant 0 : index
    %c2_47 = arith.constant 2 : index
    %c0_48 = arith.constant 0 : index
    %c0_49 = arith.constant 0 : index
    %40 = vector.load %arg4[%c0_46, %c2_47, %c0_48, %c0_49] : memref<1x3x2x128xf32, #tpu.memory_space<vmem>>, vector<1x1x2x128xf32>
    %41 = vector.shape_cast %40 : vector<1x1x2x128xf32> to vector<2x128xf32>
    %c0_50 = arith.constant 0 : index
    %c6 = arith.constant 6 : index
    %c0_51 = arith.constant 0 : index
    %c0_52 = arith.constant 0 : index
    %42 = vector.load %arg2[%c0_50, %c6, %c0_51, %c0_52] : memref<1x9x2x128xf32, #tpu.memory_space<vmem>>, vector<1x1x2x128xf32>
    %43 = vector.shape_cast %42 : vector<1x1x2x128xf32> to vector<2x128xf32>
    %44 = arith.mulf %43, %1 : vector<2x128xf32>
    %45 = arith.addf %41, %44 : vector<2x128xf32>
    %c0_53 = arith.constant 0 : index
    %c7 = arith.constant 7 : index
    %c0_54 = arith.constant 0 : index
    %c0_55 = arith.constant 0 : index
    %46 = vector.load %arg2[%c0_53, %c7, %c0_54, %c0_55] : memref<1x9x2x128xf32, #tpu.memory_space<vmem>>, vector<1x1x2x128xf32>
    %47 = vector.shape_cast %46 : vector<1x1x2x128xf32> to vector<2x128xf32>
    %48 = arith.mulf %47, %3 : vector<2x128xf32>
    %49 = arith.addf %45, %48 : vector<2x128xf32>
    %c0_56 = arith.constant 0 : index
    %c8 = arith.constant 8 : index
    %c0_57 = arith.constant 0 : index
    %c0_58 = arith.constant 0 : index
    %50 = vector.load %arg2[%c0_56, %c8, %c0_57, %c0_58] : memref<1x9x2x128xf32, #tpu.memory_space<vmem>>, vector<1x1x2x128xf32>
    %51 = vector.shape_cast %50 : vector<1x1x2x128xf32> to vector<2x128xf32>
    %52 = arith.mulf %51, %5 : vector<2x128xf32>
    %53 = arith.addf %49, %52 : vector<2x128xf32>
    %c0_59 = arith.constant 0 : index
    %c2_60 = arith.constant 2 : index
    %c0_61 = arith.constant 0 : index
    %c0_62 = arith.constant 0 : index
    %54 = vector.load %arg5[%c0_59, %c2_60, %c0_61, %c0_62] : memref<1x3x2x128xf32, #tpu.memory_space<vmem>>, vector<1x1x2x128xf32>
    %55 = vector.shape_cast %54 : vector<1x1x2x128xf32> to vector<2x128xf32>
    %56 = vector.shape_cast %53 : vector<2x128xf32> to vector<1x1x2x128xf32>
    tpu.vector_store %arg5[%c0_59, %c2_60, %c0_61, %c0_62], %56 {strides = array<i32>} : memref<1x3x2x128xf32, #tpu.memory_space<vmem>>, vector<1x1x2x128xf32>,
    return
  }
  func.func @transform_0(%arg0: i32, %arg1: i32) -> (i32, i32, i32, i32) {
    %c0_i32 = arith.constant 0 : i32
    %c0_i32_0 = arith.constant 0 : i32
    %c0_i32_1 = arith.constant 0 : i32
    return %arg0, %c0_i32, %arg1, %c0_i32_0 : i32, i32, i32, i32
  }
  func.func @transform_1(%arg0: i32, %arg1: i32) -> (i32, i32, i32, i32) {
    %c0_i32 = arith.constant 0 : i32
    %c0_i32_0 = arith.constant 0 : i32
    %c0_i32_1 = arith.constant 0 : i32
    return %arg0, %c0_i32, %arg1, %c0_i32_0 : i32, i32, i32, i32
  }
  func.func @transform_2(%arg0: i32, %arg1: i32) -> (i32, i32, i32, i32) {
    %c0_i32 = arith.constant 0 : i32
    %c0_i32_0 = arith.constant 0 : i32
    %c0_i32_1 = arith.constant 0 : i32
    return %arg0, %c0_i32, %arg1, %c0_i32_0 : i32, i32, i32, i32
  }
  func.func @transform_3(%arg0: i32, %arg1: i32) -> (i32, i32, i32, i32) {
    %c0_i32 = arith.constant 0 : i32
    %c0_i32_0 = arith.constant 0 : i32
    %c0_i32_1 = arith.constant 0 : i32
    return %arg0, %c0_i32, %arg1, %c0_i32_0 : i32, i32, i32, i32
  }
}

</mosaic_0001>

<bundles_post_ra>
// kernel: tpu_custom_call.1
= control target key start
LH: loop header
LB: loop body
LE: loop exit
PB: predicated region body
PF: predicated region fallthrough
CT: control target
= control target key end

     0   :  { %s1019_s0 = inlined_call_operand.hbm [shape: f32[2,9,2,128], index: 0, kind: input, shape index: {}]   ;;  %s1020_s1 = inlined_call_operand.hbm [shape: f32[2,3,2,128], index: 1, kind: input, shape index: {}]   ;;  %s1021_s2 = inlined_call_operand.hbm [shape: f32[2,3,2,128], index: 2, kind: input, shape index: {}]   ;;  %s1022_s3 = inlined_call_operand.hbm [shape: f32[2,3,2,128], index: 3, kind: output, shape index: {}]  }
   0x1   :  { %1031 = sst [smem:[#allocation16_spill]] %s1020_s1 }
   0x2   :  { %8 = vsyncpa [#allocation3], 0 }
   0x3   :  { %10 = vsyncpa [#allocation3 + $0x1], 0 }
   0x4   :  { %11 = vsyncpa [#allocation6], 0 }
   0x5   :  { %13 = vsyncpa [#allocation6 + $0x1], 0 }
   0x6   :  { %14 = vsyncpa [#allocation4], 0 }
   0x7   :  { %16 = vsyncpa [#allocation4 + $0x1], 0  ;;  %s794_s12 = smov 0   ;;  %s796_s13 = smov 0  }
   0x8   :  { %s798_s14 = smov 0   ;;  %s800_s15 = smov 0  }
   0x9   :  { %s802_s16 = smov 0   ;;  %s804_s17 = smov 0  }
   0xa LB: > { %1032 = sst [smem:[#allocation12_spill]] %s752_s14  ;;  %s825_s18 = sadd.s32 4294967295, %s764_s17   ;;  %s764_s17 = sphi %s804_s17, %s22_s17   ;;  %s760_s16 = sphi %s802_s16, %s1053_s16   ;;  %s756_s15 = sphi %s800_s15, %s1052_s15   ;;  %s752_s14 = sphi %s798_s14, %s1048_s14   ;;  %s748_s13 = sphi %s796_s13, %s1051_s13   ;;  %s744_s12 = sphi %s794_s12, %s1050_s12  }
   0xb   : > { %1033 = sst [smem:[#allocation13_spill]] %s764_s17  ;;  %s487_s19 = sadd.s32 4294967294, %s764_s17  }
   0xc   : > { %s34_s20 = sadd.s32 1, %s760_s16  ;;  %s43_s21 = sadd.s32 1, %s752_s14 }
   0xd   : > { %p36_p0 = scmp.ge.s32.totalorder %s34_s20, 2  ;;  %p50_p1 = scmp.ne.s32.totalorder %s752_s14, %s748_s13 }
   0xe   : > { %p51_p2 = scmp.eq.s32.totalorder %s764_s17, 0  ;;  %p56_p3 = scmp.ne.s32.totalorder %s748_s13, %s744_s12 }
   0xf   : > { %s1055_s20 = smov (%p36_p0, %s34_s20), 0  ;;  %p57_p5 = scmp.eq.s32.totalorder %s825_s18, 0 }
  0x10   : > { %1034 = sst [smem:[#allocation14_spill]] %s1055_s20  ;;  %p837_p4 = por %p51_p2, %p50_p1 }
  0x11   : > { %s38_s23 = ssub.s32 %s760_s16, %s1055_s20  ;;  %p138_p6 = scmp.eq.s32.totalorder %s825_s18, 1 }
  0x12   : > { %p41_p7 = scmp.eq.s32.totalorder %s38_s23, 0  ;;  %p845_p8 = por %p57_p5, %p56_p3 }
  0x13   : > { %p849_p9 = por %p138_p6, %p50_p1  ;;  %p144_p10 = scmp.eq.s32.totalorder %s487_s19, 1 }
  0x14   : > { %s854_s26 = scalar_select %p41_p7, %s752_s14, %s43_s21  }
  0x15   : > { %p856_p11 = por %p144_p10, %p56_p3  ;;  %p542_p13 = scmp.lt.s32.totalorder %s764_s17, 2 }
  0x16   : > { %1038 = sst [smem:[#allocation15_spill]] %s854_s26  ;;  %s863_s28 = sand.u32 1, %s752_s14  }
  0x17   : > { %p867_p0 = pnand %p542_p13, %p837_p4  ;;  %s186_s30 = sand.u32 1, %s764_s17  }
  0x18   : > { %s513_s4 = smul.u32 6, %s863_s28  ;;  %p493_p1 = scmp.ge.s32.totalorder %s764_s17, 1 }
  0x19   : > { %s514_s5 = smul.u32 96, %s760_s16  ;;  %s1041_s1 = sld [smem:[#allocation16_spill]] }
  0x1a   : > { %s190_s9 = scalar_lea.vmem [#allocation5], %s513_s4  ;;  %p228_p2 = scmp.lt.s32.totalorder %s764_s17, 3 }
  0x1b   : > { %s198_s10 = sshll.u32 %s190_s9, 4  ;;  %s883_s11 = scalar_lea.sflag [#allocation6], %s186_s30  ;;  %s199_s10 = int_to_ptr.vmem [resolvable:$true] %s198_s10 }
  0x1c   : > { %p598_p3 = pneg %p867_p0  ;;  %s609_s19 = scalar_lea.vmem %s199_s10, 96 }
  0x1d   : > { %p610_p4 = scmp.ne.s32.totalorder %s199_s10, %s609_s19  ;;  %s766_s21 = smov [#allocation5]  }
  0x1e   : > { %s614_s22 = sshll.u32 %s766_s21, 4  ;;  %s615_s22 = int_to_ptr.vmem [resolvable:$false] %s614_s22 }
  0x1f   : > { %s197_s8 = scalar_lea.hbm %s1041_s1, %s514_s5  ;;  %p612_p5 = pnand %p610_p4, %p598_p3 }
  0x20   : > { %s616_s23 = scalar_lea.vmem %s615_s22, 192  ;;  %p617_p7 = scmp.lt.s32.totalorder %s199_s10, %s615_s22 }
  0x21   : > { %p613_p6 = pneg %p612_p5  ;;  %p618_p10 = scmp.lt.s32.totalorder %s616_s23, %s609_s19 }
  0x23   : > { %p619_p13 = por %p618_p10, %p617_p7 }
  0x25   : > { %p620_p12 = pnand %p619_p13, %p613_p6 }
  0x27   : > { %623 = shalt.err (!%p620_p12)
}
  0x28   : > { %s1025_s6 = smov 32   ;;  %s1027_s30 = smov 2  }
  0x29   : > { %534 = dma.hbm_to_vmem [thread:$0]  (!%p867_p0), %s197_s8, 96, %s199_s10, %s883_s11, %s1025_s6, %s1025_s6, %s1027_s30  }
  0x2a   : > { %p900_p12 = pnand %p493_p1, %p228_p2  ;;  %s511_s9 = smul.u32 18, %s863_s28 }
  0x2b   : > { %s512_s19 = smul.u32 288, %s760_s16  ;;  %s911_s23 = scalar_lea.hbm %s1021_s2, %s514_s5 }
  0x2c   : > { %s212_s1 = scalar_lea.vmem [#allocation7], %s513_s4  ;;  %s168_s10 = scalar_lea.vmem [#allocation2], %s511_s9 }
  0x2d   : > { %s220_s20 = sshll.u32 %s212_s1, 4  ;;  %s175_s8 = scalar_lea.hbm %s1019_s0, %s512_s19  ;;  %s918_s20 = int_to_ptr.vmem [resolvable:$true] %s220_s20 }
  0x2e   : > { %s176_s6 = sshll.u32 %s168_s10, 4  ;;  %s165_s30 = scalar_lea.sflag [#allocation3], %s863_s28  ;;  %s177_s6 = int_to_ptr.vmem [resolvable:$true] %s176_s6 }
  0x2f   : > { %s637_s17 = scalar_lea.vmem %s177_s6, 288  ;;  %s769_s5 = smov [#allocation2]  }
  0x30   : > { %p638_p1 = scmp.ne.s32.totalorder %s177_s6, %s637_s17  ;;  %s642_s21 = sshll.u32 %s769_s5, 4  ;;  %s643_s21 = int_to_ptr.vmem [resolvable:$false] %s642_s21 }
  0x31   : > { %s644_s1 = scalar_lea.vmem %s643_s21, 576  ;;  %p645_p5 = scmp.lt.s32.totalorder %s177_s6, %s643_s21 }
  0x32   : > { %p640_p2 = pnand %p638_p1, %p598_p3  ;;  %p646_p6 = scmp.lt.s32.totalorder %s644_s1, %s637_s17 }
  0x34   : > { %p641_p4 = pneg %p640_p2  ;;  %p647_p7 = por %p646_p6, %p645_p5 }
  0x36   : > { %p648_p10 = pnand %p647_p7, %p641_p4 }
  0x38   : > { %651 = shalt.err (!%p648_p10)
}
  0x39   : > { %s1043_s14 = smov 2   ;;  %s1044_s26 = smov 32  }
  0x3a   : > { %531 = dma.hbm_to_vmem [thread:$0]  (!%p867_p0), %s175_s8, 288, %s177_s6, %s165_s30, %s1044_s26, %s1044_s26, %s1043_s14  }
  0x3b   : > { %s665_s28 = scalar_lea.vmem %s918_s20, 96  ;;  %s770_s17 = smov [#allocation7]  }
  0x3c   : > { %p666_p13 = scmp.ne.s32.totalorder %s918_s20, %s665_s28  ;;  %s670_s4 = sshll.u32 %s770_s17, 4  ;;  %s671_s4 = int_to_ptr.vmem [resolvable:$false] %s670_s4 }
  0x3d   : > { %s672_s9 = scalar_lea.vmem %s671_s4, 192  ;;  %p673_p4 = scmp.lt.s32.totalorder %s918_s20, %s671_s4 }
  0x3e   : > { %p668_p1 = pnand %p666_p13, %p598_p3  ;;  %p674_p5 = scmp.lt.s32.totalorder %s672_s9, %s665_s28 }
  0x40   : > { %p669_p2 = pneg %p668_p1  ;;  %p675_p6 = por %p674_p5, %p673_p4 }
  0x42   : > { %p676_p7 = pnand %p675_p6, %p669_p2 }
  0x44   : > { %679 = shalt.err (!%p676_p7)
}
  0x45   : > { %537 = dma.hbm_to_vmem [thread:$0]  (!%p867_p0), %s911_s23, 96, %s918_s20, %s883_s11, %s1044_s26, %s1044_s26, %s1043_s14  }
  0x46   : > { %232 = sbr.rel (%p900_p12) target bundleno = 110 (0x6e), region = 32  ;;  %s946_s6 = sand.u32 (!%p900_p12), 1, %s748_s13  }
  0x47   : > { %s517_s30 = smul.u32 (!%p900_p12), 18, %s946_s6  ;;  %s235_s19 = scalar_lea.sflag (!%p900_p12), [#allocation3], %s946_s6 }
  0x49   : > { %s238_s22 = scalar_lea.vmem (!%p900_p12), [#allocation2], %s517_s30 }
  0x4b   : > { %731 = dma.done.wait (%p845_p8), %s235_s19, 288  }
  0x4c   : > { %733 = vsyncadd (%p845_p8), %s235_s19, 4294967008  ;;  %s243_s20 = sand.u32 1, %s825_s18   ;;  %s956_s29 = smul.u32 6, %s946_s6 }
  0x4d   : > { %s244_s11 = scalar_lea.sflag [#allocation6], %s243_s20 }
  0x4e   : > { %s247_s7 = scalar_lea.vmem [#allocation5], %s956_s29 }
  0x4f   : > { %735 = dma.done.wait (%p845_p8), %s244_s11, 192  }
  0x50   : > { %737 = vsyncadd (%p845_p8), %s244_s11, 4294967104  ;;  %v289_v0 = vld [vmem:[%s247_s7] sm:$0x3]  ;;  %v494_v1 = vld [vmem:[%s247_s7 + $0x2] sm:$0x3]  ;;  %s256_s23 = scalar_lea.vmem [#allocation7], %s956_s29 }
  0x51   : > { %v495_v2 = vld [vmem:[%s247_s7 + $0x4] sm:$0x3]  ;;  %v294_v3 = vld [vmem:[%s256_s23] sm:$0x3]  ;;  %v295_v4 = vld [vmem:[%s238_s22] sm:$0x3] }
  0x52   : > { %v496_v5 = vld [vmem:[%s238_s22 + $0x2] sm:$0x3]  ;;  %v296_v6 = vmul.f32 %v295_v4, %v289_v0  ;;  %v497_v8 = vld [vmem:[%s238_s22 + $0x4] sm:$0x3]  ;;  %v498_v9 = vld [vmem:[%s256_s23 + $0x2] sm:$0x3] }
  0x53   : > { %v300_v7 = vmul.f32 %v496_v5, %v494_v1  ;;  %v499_v10 = vld [vmem:[%s238_s22 + $0x6] sm:$0x3]  ;;  %v500_v12 = vld [vmem:[%s238_s22 + $0x8] sm:$0x3]  ;;  %v501_v13 = vld [vmem:[%s238_s22 + $0xa] sm:$0x3]  ;;  %v304_v16 = vmul.f32 %v497_v8, %v495_v2 }
  0x54   : > { %v311_v11 = vmul.f32 %v499_v10, %v289_v0  ;;  %v503_v14 = vld [vmem:[%s256_s23 + $0x4] sm:$0x3]  ;;  %v297_v15 = vadd.f32 %v296_v6, %v294_v3  ;;  %v315_v17 = vmul.f32 %v500_v12, %v494_v1  ;;  %v504_v18 = vld [vmem:[%s238_s22 + $0xc] sm:$0x3]  ;;  %v505_v19 = vld [vmem:[%s238_s22 + $0xe] sm:$0x3]  ;;  %v319_v22 = vmul.f32 %v501_v13, %v495_v2 }
  0x55   : > { %v506_v20 = vld [vmem:[%s238_s22 + $0x10] sm:$0x3]  ;;  %v327_v23 = vmul.f32 %v504_v18, %v289_v0  ;;  %v331_v24 = vmul.f32 %v505_v19, %v494_v1  ;;  %s288_s18 = scalar_lea.vmem [#allocation8], %s956_s29  ;;  %s519_s8 = smul.u32 96, %s756_s15 }
  0x56   : > { %v312_v21 = vadd.f32 %v498_v9, %v311_v11  ;;  %v301_v25 = vadd.f32 %v300_v7, %v297_v15  ;;  %s354_s24 = sshll.u32 %s288_s18, 4  ;;  %v335_v28 = vmul.f32 %v506_v20, %v495_v2  ;;  %s340_s1 = scalar_lea.sflag [#allocation4], %s946_s6  ;;  %s966_s24 = int_to_ptr.vmem [resolvable:$true] %s354_s24 }
  0x57   : > { %v328_v27 = vadd.f32 %v503_v14, %v327_v23  ;;  %s971_s21 = scalar_lea.hbm %s1022_s3, %s519_s8  ;;  %s680_s14 = scalar_lea.vmem %s966_s24, 96 }
  0x58   : > { %v316_v26 = vadd.f32 %v315_v17, %v312_v21  ;;  %v305_v29 = vadd.f32 %v304_v16, %v301_v25  ;;  %p681_p8 = scmp.ne.s32.totalorder %s966_s24, %s680_s14  ;;  %s771_s15 = smov [#allocation8]  }
  0x59   : > { %v332_v31 = vadd.f32 %v331_v24, %v328_v27  ;;  %s684_s26 = sshll.u32 %s771_s15, 4  ;;  %s685_s26 = int_to_ptr.vmem [resolvable:$false] %s684_s26 }
  0x5a   : > { %v320_v30 = vadd.f32 %v319_v22, %v316_v26  ;;  %306 = vst [vmem:[%s288_s18] sm:$0x3] %v305_v29  ;;  %p682_p0 = pnand %p681_p8, %p849_p9  ;;  %s686_s28 = scalar_lea.vmem %s685_s26, 192 }
  0x5b   : > { %v336_v32 = vadd.f32 %v335_v28, %v332_v31  ;;  %p687_p12 = scmp.lt.s32.totalorder %s966_s24, %s685_s26  ;;  %p688_p10 = scmp.lt.s32.totalorder %s686_s28, %s680_s14 }
  0x5c   : > { %502 = vst [vmem:[%s288_s18 + $0x2] sm:$0x3] %v320_v30  ;;  %p683_p3 = pneg %p682_p0 }
  0x5d   : > { %507 = vst [vmem:[%s288_s18 + $0x4] sm:$0x3] %v336_v32  ;;  %p689_p13 = por %p688_p10, %p687_p12 }
  0x5f   : > { %p690_p1 = pnand %p689_p13, %p683_p3 }
  0x61   : > { %693 = shalt.err (!%p690_p1)
}
  0x62   : > { %s694_s17 = scalar_lea.hbm %s971_s21, 96  ;;  %s698_s30 = scalar_lea.hbm %s1022_s3, 192 }
  0x63   : > { %p695_p2 = scmp.ne.s32.totalorder %s971_s21, %s694_s17  ;;  %p699_p6 = scmp.lt.s32.totalorder %s971_s21, %s1022_s3 }
  0x64   : > { %p700_p7 = scmp.lt.s32.totalorder %s698_s30, %s694_s17 }
  0x65   : > { %p696_p4 = pnand %p695_p2, %p849_p9 }
  0x66   : > { %p701_p8 = por %p700_p7, %p699_p6 }
  0x67   : > { %p697_p5 = pneg %p696_p4 }
  0x69   : > { %p702_p0 = pnand %p701_p8, %p697_p5 }
  0x6b   : > { %705 = shalt.err (!%p702_p0)
}
  0x6c   : > { %s772_s20 = smov 32   ;;  %s773_s29 = smov 2  }
  0x6d   : > { %526 = dma.vmem_to_hbm [thread:$0]  (%p849_p9), %s966_s24, 96, %s971_s21, %s340_s1, %s772_s20, %s772_s20, %s773_s29  }
  0x6e PF: > { %s1045_s11 = sld [smem:[#allocation13_spill]]  ;;  %s369_s7 = sand.u32 1, %s744_s12  }
  0x6f   : > { %s370_s23 = scalar_lea.sflag [#allocation4], %s369_s7 }
  0x74   : > { %p1046_p3 = scmp.ge.s32.totalorder %s1045_s11, 2 }
  0x76   : > { %p539_p12 = pnand %p1046_p3, %p856_p11 }
  0x78   : > { %p540_p10 = pneg %p539_p12 }
  0x7a   : > { %739 = dma.done.wait (%p540_p10), %s370_s23, 96  }
  0x7b   : > { %741 = vsyncadd (%p540_p10), %s370_s23, 4294967200  ;;  %s22_s17 = sadd.s32 1, %s1045_s11   ;;  %s1047_s18 = sld [smem:[#allocation12_spill]] }
  0x7c   : > { %p19_p13 = scmp.ge.s32.totalorder %s22_s17, 4   ;;  %s1048_s14 = sld [smem:[#allocation15_spill]] }
  0x7d   : > { %s1049_s25 = sld [smem:[#allocation14_spill]]  ;;  %s1050_s12 = smov %s748_s13 }
  0x7e   : > { %s1052_s15 = smov %s760_s16 }
  0x7f   :  { %21 = sbr.rel (!%p19_p13) target bundleno = 10 (0xa), region = 115 }
  0x81   : > { %s1051_s13 = smov %s1047_s18 }
  0x83   : > { %s1053_s16 = smov %s1049_s25 }
  0x84   :  { %375 = vsyncpa [#allocation3], 1 }
  0x85   :  { %377 = vsyncpa [#allocation3 + $0x1], 1 }
  0x86   :  { %378 = vsyncpa [#allocation6], 1 }
  0x87   :  { %380 = vsyncpa [#allocation6 + $0x1], 1 }
  0x88   :  { %381 = vsyncpa [#allocation4], 1 }
  0x89   :  { %383 = vsyncpa [#allocation4 + $0x1], 1 }

</bundles_post_ra>
